<compile_context>
chip_gen: v7x
topology: tpu7x:2x2x1
jax: 0.10.0
libtpu: 0.0.40
codegen_flags: <defaults>
</compile_context>

<pallas_src>
import functools

import jax
import jax.numpy as jnp
from jax.experimental import pallas as pl
from jax.experimental.pallas import tpu as pltpu


def _round_up(x, m):
    return (x + m - 1) // m * m


def _cdiv(a, b):
    return -(-a // b)


# ---------------------------------------------------------------------------
# Kernel: one lane-dense MXU matmul over the fused weight slab.
#   cols [0, C)        -> out1 logits      (x @ W1^T + b1)
#   cols [C, C+L)      -> projection       (x @ Wp^T + bp)
#   cols [C+L, C+L+C)  -> out2 logits      ((x @ Wp^T + bp) @ W2^T + b2, folded)
# The optional task ReLU is a single max against a resident "floor" row.
# ---------------------------------------------------------------------------
def _fused_heads_kernel(x_ref, w_ref, b_ref, floor_ref, out_ref):
    acc = jnp.dot(x_ref[...].astype(jnp.bfloat16), w_ref[...],
                  preferred_element_type=jnp.float32)      # [tile_b, N_pad] f32
    acc = acc + b_ref[...]                                  # fused bias (broadcast)
    out_ref[...] = jnp.maximum(acc, floor_ref[...])         # ReLU-on-heads / no-op


def prepare_fused_params(params):
    """One-time (parameter-load-time) fusion of the three head GEMMs.

    params: w1_t [H, C], b1 [1, C], wp_t [H, L], bp [1, L], w2_t [L, C], b2 [1, C]
    Returns a dict consumed by fine_tuned_model2_forward.  Amortizes the
    Wp@W2 fold, the zero-slab scatter-pads and the bf16 cast across all calls.
    """
    w1_t = jnp.asarray(params["w1_t"], jnp.float32)
    b1 = jnp.asarray(params["b1"], jnp.float32).reshape(1, -1)
    wp_t = jnp.asarray(params["wp_t"], jnp.float32)
    bp = jnp.asarray(params["bp"], jnp.float32).reshape(1, -1)
    w2_t = jnp.asarray(params["w2_t"], jnp.float32)
    b2 = jnp.asarray(params["b2"], jnp.float32).reshape(1, -1)

    H, C = w1_t.shape
    L = wp_t.shape[1]
    N = 2 * C + L
    H_pad = _round_up(H, 128)
    N_pad = _round_up(N, 128)

    # Fold the dependent second head (proj -> out2) into the same matmul.
    # Valid because dropout between proj and head2 is identity in eval mode.
    w_fused = wp_t @ w2_t                    # [H, C]
    b2_fused = bp @ w2_t + b2                # [1, C]

    w_big = jnp.zeros((H_pad, N_pad), jnp.float32)
    w_big = w_big.at[:H, :C].set(w1_t)
    w_big = w_big.at[:H, C:C + L].set(wp_t)
    w_big = w_big.at[:H, C + L:C + L + C].set(w_fused)

    b_big = jnp.zeros((1, N_pad), jnp.float32)
    b_big = b_big.at[:, :C].set(b1)
    b_big = b_big.at[:, C:C + L].set(bp)
    b_big = b_big.at[:, C + L:C + L + C].set(b2_fused)

    neg = jnp.float32(jnp.finfo(jnp.float32).min)
    col = jnp.arange(N_pad)[None, :]
    is_head = (col < C) | ((col >= C + L) & (col < C + L + C))
    floor_relu = jnp.where(is_head, jnp.float32(0.0), neg)   # ReLU on heads only
    floor_none = jnp.full((1, N_pad), neg, jnp.float32)      # identity

    return {
        "w_bf": w_big.astype(jnp.bfloat16),
        "b_big": b_big,
        "floor_relu": floor_relu,
        "floor_none": floor_none,
        "H": H, "C": C, "L": L, "H_pad": H_pad, "N_pad": N_pad,
    }


def fine_tuned_model2_forward(task_name, pooled_output, fused, *, tile_b=None):
    """Pallas implementation of FineTunedModel2.forward after the encoder.

    pooled_output : [B, H] float32 or bfloat16 (encoder pooled output)
    fused         : output of prepare_fused_params
    Returns (out1 [B, C], out2 [B, C], proj [B, L]) in float32.
    """
    x = jnp.asarray(pooled_output)
    if x.dtype not in (jnp.float32, jnp.bfloat16):
        x = x.astype(jnp.float32)
    B, H = x.shape
    H_pad, N_pad = fused["H_pad"], fused["N_pad"]
    C, L = fused["C"], fused["L"]
    assert H == fused["H"], "pooled_output hidden size mismatch"

    # ---- batch tiling: big tiles (~512 rows) to amortize per-step overhead,
    # pad B only up to steps*tile_b with tile_b ~= cdiv(B,steps); for medium/
    # large B use an even number of >=2 steps so both v7x TensorCores run. ----
    B8 = _round_up(B, 8)
    if tile_b is None:
        steps = _cdiv(B8, 512)
        if B8 >= 256:
            steps = max(steps, 2)
        if steps > 1 and steps % 2:
            steps += 1
        tile_b = _round_up(_cdiv(B8, steps), 8)
    tile_b = max(8, _round_up(int(tile_b), 8))
    steps = _cdiv(B8, tile_b)
    B_pad = steps * tile_b

    if (B_pad != B) or (H_pad != H):
        x = jnp.pad(x, ((0, B_pad - B), (0, H_pad - H)))

    floor = fused["floor_relu"] if task_name == "sts-b" else fused["floor_none"]

    # ---- VMEM budget derived from the device (v7x: 64 MiB/TC; v5e/v6e: 128). ----
    try:
        vmem_cap = int(pltpu.get_tpu_info().vmem_capacity_bytes)
    except Exception:  # non-TPU / interpret fallback
        vmem_cap = 64 << 20
    x_bytes = x.dtype.itemsize
    weight_bytes = H_pad * N_pad * 2 + 2 * N_pad * 4              # bf16 W + bias + floor
    stream_bytes = 2 * tile_b * H_pad * x_bytes + 2 * tile_b * N_pad * 4  # dbl-buffered
    vmem_limit = int(min(int(vmem_cap * 0.75),
                         max(16 << 20, weight_bytes + stream_bytes + (2 << 20))))

    cost = pl.CostEstimate(
        flops=2 * B_pad * H_pad * N_pad,
        transcendentals=0,
        bytes_accessed=B_pad * H_pad * x_bytes + weight_bytes + B_pad * N_pad * 4)

    out = pl.pallas_call(
        _fused_heads_kernel,
        out_shape=jax.ShapeDtypeStruct((B_pad, N_pad), jnp.float32),
        grid=(steps,),
        in_specs=[
            pl.BlockSpec((tile_b, H_pad), lambda i: (i, 0)),   # x tile (streamed)
            pl.BlockSpec((H_pad, N_pad), lambda i: (0, 0)),    # fused weights (resident)
            pl.BlockSpec((1, N_pad), lambda i: (0, 0)),        # fused bias (resident)
            pl.BlockSpec((1, N_pad), lambda i: (0, 0)),        # relu floor (resident)
        ],
        out_specs=pl.BlockSpec((tile_b, N_pad), lambda i: (i, 0)),
        compiler_params=pltpu.CompilerParams(
            dimension_semantics=("parallel",),
            vmem_limit_bytes=vmem_limit),
        cost_estimate=cost,
    )(x, fused["w_bf"], fused["b_big"], floor)

    out1 = out[:B, :C]
    proj = out[:B, C:C + L]
    out2 = out[:B, C + L:C + L + C]
    return out1, out2, proj


def init_params(key, hidden_size, latent_size, num_labels):
    """Deterministic parameter init mirroring the PyTorch module."""
    k1, k2, k3, k4 = jax.random.split(key, 4)
    # SequenceClassificationHead._init_weights: normal(0, 0.02), bias zero.
    w1 = 0.02 * jax.random.normal(k1, (num_labels, hidden_size), jnp.float32)
    b1 = jnp.zeros((1, num_labels), jnp.float32)
    w2 = 0.02 * jax.random.normal(k2, (num_labels, latent_size), jnp.float32)
    b2 = jnp.zeros((1, num_labels), jnp.float32)
    # projection_head: orthogonal parametrization of Linear(H -> L); build a
    # column-orthonormal [L, H] weight via QR (L >= H).
    a = jax.random.normal(k3, (latent_size, hidden_size), jnp.float32)
    q, _ = jnp.linalg.qr(a)                      # [L, H], Q^T Q = I
    wp = q
    # Linear default bias init: U(-1/sqrt(H), 1/sqrt(H)).
    bound = 1.0 / jnp.sqrt(jnp.asarray(hidden_size, jnp.float32))
    bp = jax.random.uniform(k4, (1, latent_size), jnp.float32, -bound, bound)
    return {
        "w1_t": jnp.asarray(w1.T),  # [H, C]
        "b1": b1,
        "wp_t": jnp.asarray(wp.T),  # [H, L]
        "bp": bp,
        "w2_t": jnp.asarray(w2.T),  # [L, C]
        "b2": b2,
    }


def _reference(task_name, x, p):
    o1 = x @ p["w1_t"] + p["b1"]
    pr = x @ p["wp_t"] + p["bp"]
    o2 = pr @ p["w2_t"] + p["b2"]
    if task_name == "sts-b":
        o1 = jnp.maximum(o1, 0.0)
        o2 = jnp.maximum(o2, 0.0)
    return o1, o2, pr


if __name__ == "__main__":
    B, H, L, C = 8, 128, 256, 8   # batch, hidden_size, latent_size, num_labels
    key = jax.random.PRNGKey(0)
    kx, kp = jax.random.split(key)
    pooled = jax.random.normal(kx, (B, H), jnp.float32)
    params = init_params(kp, H, L, C)

    fused = prepare_fused_params(params)          # one-time, amortized cost
    jax.block_until_ready(fused["w_bf"])

    out1, out2, proj = fine_tuned_model2_forward("sts-b", pooled, fused)
    jax.block_until_ready((out1, out2, proj))

    r1, r2, rp = _reference("sts-b", pooled, params)
    # bf16 matmul inputs (f32 accumulation) -> tolerance loosened accordingly.
    assert out1.shape == r1.shape and out2.shape == r2.shape and proj.shape == rp.shape
    assert jnp.allclose(out1, r1, atol=3e-2, rtol=3e-2)
    assert jnp.allclose(out2, r2, atol=3e-2, rtol=3e-2)
    assert jnp.allclose(proj, rp, atol=3e-2, rtol=3e-2)

    # also exercise the non-relu (non-'sts-b') path
    o1b, o2b, prb = fine_tuned_model2_forward("mnli", pooled, fused)
    jax.block_until_ready((o1b, o2b, prb))
    r1b, r2b, rpb = _reference("mnli", pooled, params)
    assert jnp.allclose(o1b, r1b, atol=3e-2, rtol=3e-2)
    assert jnp.allclose(o2b, r2b, atol=3e-2, rtol=3e-2)
    assert jnp.allclose(prb, rpb, atol=3e-2, rtol=3e-2)

    print("KERNEL_OK")
</pallas_src>

<mosaic_0001>
module attributes {stable_mosaic.version = 11 : i64} {
  func.func @_fused_heads_kernel(%arg0: i32, %arg1: memref<8x128xf32, #tpu.memory_space<vmem>>, %arg2: memref<128x384xbf16, #tpu.memory_space<vmem>>, %arg3: memref<1x384xf32, #tpu.memory_space<vmem>>, %arg4: memref<1x384xf32, #tpu.memory_space<vmem>>, %arg5: memref<8x384xf32, #tpu.memory_space<vmem>>) attributes {dimension_semantics = [#tpu.dimension_semantics<parallel>], iteration_bounds = array<i64: 1>, scalar_prefetch = 0 : i64, scratch_operands = 0 : i64, tpu.core_type = #tpu.core_type<tc>, window_params = [{transform_indices = @transform_0, window_bounds = array<i64: 8, 128>}, {pipeline_mode = #tpu.pipeline_mode<synchronous>, transform_indices = @transform_1, window_bounds = array<i64: 128, 384>}, {pipeline_mode = #tpu.pipeline_mode<synchronous>, transform_indices = @transform_2, window_bounds = array<i64: 1, 384>}, {pipeline_mode = #tpu.pipeline_mode<synchronous>, transform_indices = @transform_3, window_bounds = array<i64: 1, 384>}, {transform_indices = @transform_4, window_bounds = array<i64: 8, 384>}]} {
    %c0 = arith.constant 0 : index
    %c0_0 = arith.constant 0 : index
    %0 = vector.load %arg1[%c0, %c0_0] : memref<8x128xf32, #tpu.memory_space<vmem>>, vector<8x128xf32>
    %1 = arith.truncf %0 : vector<8x128xf32> to vector<8x128xbf16>
    %c0_1 = arith.constant 0 : index
    %c0_2 = arith.constant 0 : index
    %2 = vector.load %arg2[%c0_1, %c0_2] : memref<128x384xbf16, #tpu.memory_space<vmem>>, vector<128x384xbf16>
    %cst = arith.constant dense<0.000000e+00> : vector<8x384xf32>
    %3 = tpu.matmul %1, %2, %cst {dimension_numbers = #tpu.dot_dimension_numbers<[1], [0], [0], [1], [0, 0, 1, 1], [], []>} : vector<8x128xbf16>, vector<128x384xbf16>, vector<8x384xf32> -> vector<8x384xf32>
    %c0_3 = arith.constant 0 : index
    %c0_4 = arith.constant 0 : index
    %4 = vector.load %arg3[%c0_3, %c0_4] : memref<1x384xf32, #tpu.memory_space<vmem>>, vector<1x384xf32>
    %5 = vector.broadcast %4 : vector<1x384xf32> to vector<8x384xf32>
    %6 = arith.addf %3, %5 : vector<8x384xf32>
    %c0_5 = arith.constant 0 : index
    %c0_6 = arith.constant 0 : index
    %7 = vector.load %arg4[%c0_5, %c0_6] : memref<1x384xf32, #tpu.memory_space<vmem>>, vector<1x384xf32>
    %8 = vector.broadcast %7 : vector<1x384xf32> to vector<8x384xf32>
    %9 = arith.maximumf %6, %8 : vector<8x384xf32>
    %c0_7 = arith.constant 0 : index
    %c0_8 = arith.constant 0 : index
    %10 = vector.load %arg5[%c0_7, %c0_8] : memref<8x384xf32, #tpu.memory_space<vmem>>, vector<8x384xf32>
    tpu.vector_store %arg5[%c0_7, %c0_8], %9 {strides = array<i32>} : memref<8x384xf32, #tpu.memory_space<vmem>>, vector<8x384xf32>,
    return
  }
  func.func @transform_0(%arg0: i32) -> (i32, i32) {
    %c0_i32 = arith.constant 0 : i32
    %c0_i32_0 = arith.constant 0 : i32
    return %arg0, %c0_i32 : i32, i32
  }
  func.func @transform_1(%arg0: i32) -> (i32, i32) {
    %c0_i32 = arith.constant 0 : i32
    %c0_i32_0 = arith.constant 0 : i32
    %c0_i32_1 = arith.constant 0 : i32
    return %c0_i32, %c0_i32_0 : i32, i32
  }
  func.func @transform_2(%arg0: i32) -> (i32, i32) {
    %c0_i32 = arith.constant 0 : i32
    %c0_i32_0 = arith.constant 0 : i32
    %c0_i32_1 = arith.constant 0 : i32
    return %c0_i32, %c0_i32_0 : i32, i32
  }
  func.func @transform_3(%arg0: i32) -> (i32, i32) {
    %c0_i32 = arith.constant 0 : i32
    %c0_i32_0 = arith.constant 0 : i32
    %c0_i32_1 = arith.constant 0 : i32
    return %c0_i32, %c0_i32_0 : i32, i32
  }
  func.func @transform_4(%arg0: i32) -> (i32, i32) {
    %c0_i32 = arith.constant 0 : i32
    %c0_i32_0 = arith.constant 0 : i32
    return %arg0, %c0_i32 : i32, i32
  }
}

</mosaic_0001>

<bundles_post_ra>
// kernel: tpu_custom_call.1
= control target key start
LH: loop header
LB: loop body
LE: loop exit
PB: predicated region body
PF: predicated region fallthrough
CT: control target
= control target key end

     0   :  { %9 = vsyncpa [#allocation3], 0  ;;  %s591_s0 = inlined_call_operand.hbm [shape: f32[8,128], index: 0, kind: input, shape index: {}]   ;;  %s592_s1 = inlined_call_operand.hbm [shape: bf16[128,384], index: 1, kind: input, shape index: {}]   ;;  %s593_s2 = inlined_call_operand.vmem [shape: f32[1,384], index: 2, kind: input, shape index: {}]   ;;  %s594_s3 = inlined_call_operand.vmem [shape: f32[1,384], index: 3, kind: input, shape index: {}]   ;;  %s595_s4 = inlined_call_operand.hbm [shape: f32[8,384], index: 4, kind: output, shape index: {}]  }
   0x1   :  { %10 = vsyncpa [#allocation6], 0 }
   0x2   :  { %11 = vsyncpa [#allocation4], 0  ;;  %s509_s15 = smov [#allocation2]   ;;  %s510_s17 = smov [#allocation5]  }
   0x3   :  { %s18_s16 = sshll.u32 %s509_s15, 4  ;;  %s27_s18 = sshll.u32 %s510_s17, 4  ;;  %s19_s16 = int_to_ptr.vmem [resolvable:$true] %s18_s16  ;;  %s542_s18 = int_to_ptr.vmem [resolvable:$true] %s27_s18 }
   0x4   :  { %s437_s21 = scalar_lea.hbm %s591_s0, 128 }
   0x5   :  { %p438_p0 = scmp.ne.s32.totalorder %s591_s0, %s437_s21  ;;  %p441_p1 = scmp.lt.u32.totalorder %s437_s21, %s591_s0 }
   0x7   :  { %p443_p2 = pnand %p441_p1, %p438_p0 }
   0x9   :  { %446 = shalt.err (!%p443_p2)
}
   0xa   :  { %s447_s26 = scalar_lea.vmem %s19_s16, 128  ;;  %p452_p4 = scmp.lt.s32.totalorder %s19_s16, %s19_s16 }
   0xb   :  { %p448_p3 = scmp.ne.s32.totalorder %s19_s16, %s447_s26  ;;  %p453_p5 = scmp.lt.s32.totalorder %s447_s26, %s447_s26 }
   0xd   :  { %p454_p6 = por %p453_p5, %p452_p4 }
   0xf   :  { %p455_p7 = pnand %p454_p6, %p448_p3 }
  0x11   :  { %458 = shalt.err (!%p455_p7)
}
  0x12   :  { %21 = dma.hbm_to_vmem [thread:$0]  %s591_s0, 128, %s19_s16, [#allocation3]  }
  0x13   :  { %s459_s5 = scalar_lea.hbm %s592_s1, 3072 }
  0x14   :  { %p460_p8 = scmp.ne.s32.totalorder %s592_s1, %s459_s5  ;;  %p463_p9 = scmp.lt.u32.totalorder %s459_s5, %s592_s1 }
  0x16   :  { %p465_p10 = pnand %p463_p9, %p460_p8 }
  0x18   :  { %468 = shalt.err (!%p465_p10)
}
  0x19   :  { %s469_s10 = scalar_lea.vmem %s542_s18, 3072  ;;  %p474_p12 = scmp.lt.s32.totalorder %s542_s18, %s542_s18 }
  0x1a   :  { %p470_p11 = scmp.ne.s32.totalorder %s542_s18, %s469_s10  ;;  %p475_p13 = scmp.lt.s32.totalorder %s469_s10, %s469_s10 }
  0x1c   :  { %p476_p0 = por %p475_p13, %p474_p12 }
  0x1e   :  { %p477_p1 = pnand %p476_p0, %p470_p11 }
  0x20   :  { %480 = shalt.err (!%p477_p1)
}
  0x21   :  { %s511_s0 = smov 192   ;;  %s512_s11 = smov 12  }
  0x22   :  { %33 = dma.hbm_to_vmem [thread:$0]  %s592_s1, 3072, %s542_s18, [#allocation6], %s511_s0, %s511_s0, %s512_s11  }
  0x23   :  { %503 = dma.done.wait [#allocation3], 128  }
  0x24   :  { %504 = vsyncadd [#allocation3], 4294967168 }
  0x25   :  { %505 = dma.done.wait [#allocation6], 3072  }
  0x26   :  { %506 = vsyncadd [#allocation6], 4294964224  ;;  %v513_v0 = vmov 0.0   ;;  %vm514_vm0 = vmmov 0   ;;  %v515_v1 = vmov 0   ;;  %v45_v25 = vld [vmem:[#allocation2] sm:$0xff]  ;;  %v81_v28 = vlaneseq }
  0x27   :  { %377 = vmatprep.subr.bf16.mxu1 %v513_v0  ;;  %393 = vmatprep.mubr.msk.bf16.mxu1 %vm514_vm0, %v513_v0  ;;  %v405_v2 = vld [vmem:[#allocation5 + $0x4] ss:$12 sps:$4 sm:$0xff]   ;;  %v407_v3 = vld [vmem:[#allocation5 + $0x8] ss:$12 sps:$4 sm:$0xff]   ;;  %v408_v4 = vld [vmem:[#allocation5] ss:$12 sps:$4 sm:$0xff]   ;;  %v46_v27 = vpack.c.bf16 %v45_v25, %v45_v25 }
  0x28   :  { %256 = vmatprep.mubr.bf16.mxu0 %v515_v1  ;;  %224 = vmatprep.subr.bf16.mxu0 %v405_v2  ;;  %v409_v5 = vld [vmem:[#allocation5 + $0x1c] ss:$12 sps:$4 sm:$0xff]   ;;  %v411_v6 = vld [vmem:[#allocation5 + $0x20] ss:$12 sps:$4 sm:$0xff]   ;;  %v412_v7 = vld [vmem:[#allocation5 + $0x18] ss:$12 sps:$4 sm:$0xff]  }
  0x29   :  { %378 = vmatpush3.bf16.msra.mxu1 %v407_v3  ;;  %225 = vmatpush1.bf16.msra.mxu0 %v408_v4  ;;  %v413_v8 = vld [vmem:[#allocation5 + $0x34] ss:$12 sps:$4 sm:$0xff]   ;;  %v415_v9 = vld [vmem:[#allocation5 + $0x38] ss:$12 sps:$4 sm:$0xff]   ;;  %v416_v10 = vld [vmem:[#allocation5 + $0x30] ss:$12 sps:$4 sm:$0xff]  }
  0x2a   :  { %379 = vmatprep.subr.bf16.mxu1 %v513_v0  ;;  %226 = vmatprep.subr.bf16.mxu0 %v409_v5  ;;  %v417_v11 = vld [vmem:[#allocation5 + $0x4c] ss:$12 sps:$4 sm:$0xff]   ;;  %v419_v12 = vld [vmem:[#allocation5 + $0x50] ss:$12 sps:$4 sm:$0xff]   ;;  %v420_v13 = vld [vmem:[#allocation5 + $0x48] ss:$12 sps:$4 sm:$0xff]  }
  0x2b   :  { %v421_v14 = vld [vmem:[#allocation5 + $0x64] ss:$12 sps:$4 sm:$0xff]   ;;  %v423_v15 = vld [vmem:[#allocation5 + $0x68] ss:$12 sps:$4 sm:$0xff]   ;;  %v424_v16 = vld [vmem:[#allocation5 + $0x60] ss:$12 sps:$4 sm:$0xff]  }
  0x2c   :  { %v425_v17 = vld [vmem:[#allocation5 + $0x7c] ss:$12 sps:$4 sm:$0xff]   ;;  %v427_v18 = vld [vmem:[#allocation5 + $0x80] ss:$12 sps:$4 sm:$0xff]   ;;  %v428_v19 = vld [vmem:[#allocation5 + $0x78] ss:$12 sps:$4 sm:$0xff]  }
  0x2d   :  { %380 = vmatpush3.bf16.msra.mxu1 %v411_v6  ;;  %227 = vmatpush1.bf16.msra.mxu0 %v412_v7  ;;  %v429_v20 = vld [vmem:[#allocation5 + $0x94] ss:$12 sps:$4 sm:$0xff]   ;;  %v431_v21 = vld [vmem:[#allocation5 + $0x98] ss:$12 sps:$4 sm:$0xff]   ;;  %v432_v22 = vld [vmem:[#allocation5 + $0x90] ss:$12 sps:$4 sm:$0xff]  }
  0x2e   :  { %381 = vmatprep.subr.bf16.mxu1 %v513_v0  ;;  %228 = vmatprep.subr.bf16.mxu0 %v413_v8  ;;  %v433_v23 = vld [vmem:[#allocation5 + $0xac] ss:$12 sps:$4 sm:$0xff]   ;;  %v435_v24 = vld [vmem:[#allocation5 + $0xb0] ss:$12 sps:$4 sm:$0xff]   ;;  %v436_v26 = vld [vmem:[#allocation5 + $0xa8] ss:$12 sps:$4 sm:$0xff]  }
  0x2f   :  { %v82_v29 = vshrl.u32 %v81_v28, 7  ;;  %v79_v31 = vld [vmem:[%s593_s2] sm:$0x7]  ;;  %s516_s2 = smov [#allocation7]  }
  0x30   :  { %v305_v34 = vld [vmem:[%s594_s3] sm:$0x7]  ;;  %s334_s17 = sshll.u32 %s516_s2, 4  ;;  %s335_s17 = int_to_ptr.vmem [resolvable:$true] %s334_s17 }
  0x31   :  { %382 = vmatpush3.bf16.msra.mxu1 %v415_v9  ;;  %229 = vmatpush1.bf16.msra.mxu0 %v416_v10  ;;  %v91_v30 = vsub.s32 2, %v82_v29  ;;  %v83_v32 = vsub.s32 0, %v82_v29  ;;  %v87_v33 = vsub.s32 1, %v82_v29  ;;  %s481_s3 = scalar_lea.vmem %s335_s17, 384  ;;  %p486_p3 = scmp.lt.s32.totalorder %s335_s17, %s335_s17 }
  0x32   :  { %383 = vmatprep.subr.bf16.mxu1 %v513_v0  ;;  %230 = vmatprep.subr.bf16.mxu0 %v417_v11  ;;  %p482_p2 = scmp.ne.s32.totalorder %s335_s17, %s481_s3  ;;  %p487_p4 = scmp.lt.s32.totalorder %s481_s3, %s481_s3 }
  0x33   :  { %v92_v35 = vrot.slane %v79_v31, %v91_v30  ;;  %v84_v36 = vrot.slane %v79_v31, %v83_v32  ;;  %v318_v37 = vrot.slane %v305_v34, %v91_v30  ;;  %v88_v38 = vrot.slane %v79_v31, %v87_v33 }
  0x34   :  { %v310_v40 = vrot.slane %v305_v34, %v83_v32  ;;  %v314_v44 = vrot.slane %v305_v34, %v87_v33  ;;  %p488_p5 = por %p487_p4, %p486_p3 }
  0x35   :  { %384 = vmatpush3.bf16.msra.mxu1 %v419_v12  ;;  %231 = vmatpush1.bf16.msra.mxu0 %v420_v13 }
  0x36   :  { %385 = vmatprep.subr.bf16.mxu1 %v513_v0  ;;  %232 = vmatprep.subr.bf16.mxu0 %v421_v14  ;;  %p489_p6 = pnand %p488_p5, %p482_p2 }
  0x39   :  { %386 = vmatpush3.bf16.msra.mxu1 %v423_v15  ;;  %233 = vmatpush1.bf16.msra.mxu0 %v424_v16 }
  0x3a   :  { %387 = vmatprep.subr.bf16.mxu1 %v513_v0  ;;  %234 = vmatprep.subr.bf16.mxu0 %v425_v17 }
  0x3d   :  { %388 = vmatpush3.bf16.msra.mxu1 %v427_v18  ;;  %235 = vmatpush1.bf16.msra.mxu0 %v428_v19 }
  0x3e   :  { %389 = vmatprep.subr.bf16.mxu1 %v513_v0  ;;  %236 = vmatprep.subr.bf16.mxu0 %v429_v20 }
  0x41   :  { %390 = vmatpush3.bf16.msra.mxu1 %v431_v21  ;;  %237 = vmatpush1.bf16.msra.mxu0 %v432_v22 }
  0x42   :  { %391 = vmatprep.subr.bf16.mxu1 %v513_v0  ;;  %238 = vmatprep.subr.bf16.mxu0 %v433_v23 }
  0x45   :  { %392 = vmatpush3.bf16.msra.mxu1 %v435_v24  ;;  %239 = vmatpush1.bf16.msra.mxu0 %v436_v26 }
  0x48   :  { %394 = vmatmul.mubr.bf16.vlgmr.msra.gmra.mrb[0].mxu1 %v46_v27  ;;  %257 = vmatmul.mubr.bf16.vlgmr.msra.gmra.mrb[0].mxu0 %v46_v27 }
 0x11b   :  { %v299_v39 = vpop.f32.mrb[0].mxu1  ;;  %v258_v42 = vpop.f32.mrb[0].mxu0 }
 0x11c   :  { %v300_v41 = vadd.f32 %v299_v39, %v92_v35  ;;  %v395_v43 = vpop.f32.mrb[1].mxu1  ;;  %v259_v45 = vadd.f32 %v258_v42, %v84_v36  ;;  %v260_v46 = vpop.f32.mrb[1].mxu0 }
 0x11d   :  { %v302_v47 = vpop.f32.mrb[2].mxu1  ;;  %v261_v49 = vadd.f32 %v260_v46, %v88_v38  ;;  %v262_v50 = vpop.f32.mrb[2].mxu0 }
 0x11e   :  { %v324_v48 = vmax.f32 %v300_v41, %v318_v37  ;;  %v396_v51 = vpop.f32.mrb[3].mxu1  ;;  %v322_v52 = vmax.f32 %v259_v45, %v310_v40  ;;  %v263_v53 = vpop.f32.mrb[3].mxu0 }
 0x11f   :  { %v323_v54 = vmax.f32 %v261_v49, %v314_v44 }
 0x120   :  { %327 = vst [vmem:[#allocation7 + $0x10] sm:$0xff] %v324_v48  ;;  %325 = vst [vmem:[#allocation7] sm:$0xff] %v322_v52 }
 0x121   :  { %326 = vst [vmem:[#allocation7 + $0x8] sm:$0xff] %v323_v54 }
 0x122   :  { %492 = shalt.err (!%p489_p6)
}
 0x123   :  { %s493_s20 = scalar_lea.hbm %s595_s4, 384 }
 0x124   :  { %p494_p7 = scmp.ne.s32.totalorder %s595_s4, %s493_s20  ;;  %p497_p8 = scmp.lt.u32.totalorder %s493_s20, %s595_s4 }
 0x126   :  { %p499_p9 = pnand %p497_p8, %p494_p7 }
 0x128   :  { %502 = shalt.err (!%p499_p9)
}
 0x129   :  { %337 = dma.vmem_to_hbm [thread:$0]  %s335_s17, 384, %s595_s4, [#allocation4]  }
 0x12a   :  { %507 = dma.done.wait [#allocation4], 384  }
 0x12b   :  { %508 = vsyncadd [#allocation4], 4294966912 }
 0x12c   :  { %341 = vsyncpa [#allocation3], 1 }
 0x12d   :  { %342 = vsyncpa [#allocation6], 1 }
 0x12e   :  { %343 = vsyncpa [#allocation4], 1 }

</bundles_post_ra>
